<compile_context>
chip_gen: v5e
topology: v5e:2x2
jax: 0.10.0
libtpu: 0.0.40
codegen_flags: <defaults>
</compile_context>

<pallas_src>
import jax
import jax.numpy as jnp
from jax.experimental import pallas as pl
from jax.experimental.pallas import tpu as pltpu


def _round_up(n, m):
    return ((n + m - 1) // m) * m


def discriminator_kernel(x_ref, w1_ref, b1_ref, w2_ref, b2_ref, w3_ref, b3_ref,
                         o_ref):
    # x streamed as f32; cast to bf16 in-kernel (avoids a separate HBM pass).
    x = x_ref[...].astype(jnp.bfloat16)                                # (TB, F)
    h1 = jnp.dot(x, w1_ref[...], preferred_element_type=jnp.float32)  # MXU (TB,64)
    h1 = jnp.maximum(h1 + b1_ref[...], 0.0)                           # f32 VPU relu
    h2 = jnp.dot(h1.astype(jnp.bfloat16), w2_ref[...],
                 preferred_element_type=jnp.float32)                  # MXU (TB,32)
    h2 = jnp.maximum(h2 + b2_ref[...], 0.0)                           # f32 VPU relu
    # fc3 as an MXU matmul against a resident (32, 1) bf16 column; replaces the
    # old cross-lane sum (≈5 XLU rotates + 5 VALU adds per 8 rows).
    logits = jnp.dot(h2.astype(jnp.bfloat16), w3_ref[...],
                     preferred_element_type=jnp.float32) + b3_ref[0, 0]
    # TODO(synk): if a bundle dump shows the EUP/vst slots co-binding, relayout
    # the (TB, 1) tail into a lane-dense slab before the sigmoid + store.
    o_ref[...] = jax.nn.sigmoid(logits)                               # EUP, f32


def discriminator_forward(x, params, *, block_b=8192):
    """x: (B, feat) float32; params: dict of w1,b1,w2,b2,w3,b3 (f32)."""
    B, F = x.shape

    # MXU inputs in bf16; bias / activation math stays f32.
    w1 = params["w1"].astype(jnp.bfloat16)                   # (F, 64)
    w2 = params["w2"].astype(jnp.bfloat16)                   # (64, 32)
    w3 = params["w3"].reshape(-1, 1).astype(jnp.bfloat16)    # (32, 1) MXU column
    b1 = params["b1"].astype(jnp.float32)                    # (1, 64)
    b2 = params["b2"].astype(jnp.float32)                    # (1, 32)
    b3 = params["b3"].reshape(1, 1).astype(jnp.float32)      # SMEM scalar

    # Per-tile VMEM footprint (bytes per batch row):
    #   x f32 tile, double-buffered            : 2 * 4 * F
    #   in-kernel bf16 copy of x               : 2 * F
    #   h1 f32 + h1 bf16 (64 features)         : 256 + 128
    #   h2 f32 + h2 bf16 (32 features)         : 128 + 64
    #   logits / sigmoid / out tile (2 bufs)   : ~64
    per_row = 10 * F + 640
    weight_bytes = 2 * (2 * F * 64 + 2 * 64 * 32 + 2 * 32 + 4 * 64 + 4 * 32 + 4)
    # Keep the whole tile footprint under ~24 MiB: fits v7x's 64 MiB physical
    # VMEM with headroom (and is trivially fine on v5e/v6e's 128 MiB).
    vmem_budget = 24 * 1024 * 1024 - weight_bytes
    max_tb = max(8, (vmem_budget // per_row) // 8 * 8)
    TB = min(_round_up(block_b, 8), max_tb, _round_up(B, 8))
    # Ragged tail handled by a partial last block: OOB reads only feed rows
    # whose writes are dropped (all rows are independent).
    grid = pl.cdiv(B, TB)

    resident = lambda shape: pl.BlockSpec(shape, lambda i: (0, 0))

    out = pl.pallas_call(
        discriminator_kernel,
        out_shape=jax.ShapeDtypeStruct((B, 1), jnp.float32),
        grid=(grid,),
        in_specs=[
            pl.BlockSpec((TB, F), lambda i: (i, 0)),            # x: streamed tiles
            resident(w1.shape), resident(b1.shape),             # VMEM-resident
            resident(w2.shape), resident(b2.shape),
            resident(w3.shape),
            pl.BlockSpec(memory_space=pltpu.MemorySpace.SMEM),  # b3 scalar
        ],
        out_specs=pl.BlockSpec((TB, 1), lambda i: (i, 0)),
        compiler_params=pltpu.CompilerParams(
            # TODO(synk): on v7x verify both TCs pick up grid steps; if one
            # idles, switch to core-parallel semantics / explicit core split.
            dimension_semantics=("parallel",),
            vmem_limit_bytes=48 * 1024 * 1024,
        ),
    )(x, w1, b1, w2, b2, w3, b3)

    return out


def init_params(key, feat_shape):
    """Deterministic, PyTorch-Linear-style uniform(-1/sqrt(in), 1/sqrt(in)) init."""
    ks = jax.random.split(key, 6)

    def linear(kw, kb, fan_in, fan_out):
        bound = 1.0 / jnp.sqrt(jnp.float32(fan_in))
        w = jax.random.uniform(kw, (fan_in, fan_out), jnp.float32, -bound, bound)
        b = jax.random.uniform(kb, (1, fan_out), jnp.float32, -bound, bound)
        return w, b

    w1, b1 = linear(ks[0], ks[1], feat_shape, 64)
    w2, b2 = linear(ks[2], ks[3], 64, 32)
    w3, b3 = linear(ks[4], ks[5], 32, 1)
    return {"w1": w1, "b1": b1, "w2": w2, "b2": b2, "w3": w3, "b3": b3}


def reference_forward(x, p):
    h1 = jax.nn.relu(x @ p["w1"] + p["b1"])
    h2 = jax.nn.relu(h1 @ p["w2"] + p["b2"])
    return jax.nn.sigmoid(h2 @ p["w3"] + p["b3"])


if __name__ == "__main__":
    key = jax.random.PRNGKey(0)
    k_x1, k_x2, k_p = jax.random.split(key, 3)

    feat_shape = 32
    params = init_params(k_p, feat_shape)

    # Small batch: single tile (TB clamps to round_up(B, 8)).
    x_small = jax.random.normal(k_x1, (8, feat_shape), jnp.float32)
    out_small = jax.block_until_ready(discriminator_forward(x_small, params))
    ref_small = reference_forward(x_small, params)
    assert out_small.shape == (8, 1)
    assert jnp.allclose(out_small, ref_small, atol=2e-2), "small-batch mismatch"

    # Ragged multi-tile batch: exercises the batch grid, double-buffering and
    # the partial-last-block (no wrapper pad) tail handling.
    x_big = jax.random.normal(k_x2, (200, feat_shape), jnp.float32)
    out_big = jax.block_until_ready(
        discriminator_forward(x_big, params, block_b=64))
    ref_big = reference_forward(x_big, params)
    assert out_big.shape == (200, 1)
    assert jnp.allclose(out_big, ref_big, atol=2e-2), "multi-tile mismatch"

    print("KERNEL_OK")
</pallas_src>

<mosaic_0001>
module attributes {stable_mosaic.version = 11 : i64} {
  func.func @discriminator_kernel(%arg0: i32, %arg1: memref<8x32xf32, #tpu.memory_space<vmem>>, %arg2: memref<32x64xbf16, #tpu.memory_space<vmem>>, %arg3: memref<1x64xf32, #tpu.memory_space<vmem>>, %arg4: memref<64x32xbf16, #tpu.memory_space<vmem>>, %arg5: memref<1x32xf32, #tpu.memory_space<vmem>>, %arg6: memref<32x1xbf16, #tpu.memory_space<vmem>>, %arg7: memref<1x1xf32, #tpu.memory_space<smem>>, %arg8: memref<8x1xf32, #tpu.memory_space<vmem>>) attributes {dimension_semantics = [#tpu.dimension_semantics<parallel>], iteration_bounds = array<i64: 1>, scalar_prefetch = 0 : i64, scratch_operands = 0 : i64, tpu.core_type = #tpu.core_type<tc>, window_params = [{transform_indices = @transform_0, window_bounds = array<i64: 8, 32>}, {pipeline_mode = #tpu.pipeline_mode<synchronous>, transform_indices = @transform_1, window_bounds = array<i64: 32, 64>}, {pipeline_mode = #tpu.pipeline_mode<synchronous>, transform_indices = @transform_2, window_bounds = array<i64: 1, 64>}, {pipeline_mode = #tpu.pipeline_mode<synchronous>, transform_indices = @transform_3, window_bounds = array<i64: 64, 32>}, {pipeline_mode = #tpu.pipeline_mode<synchronous>, transform_indices = @transform_4, window_bounds = array<i64: 1, 32>}, {pipeline_mode = #tpu.pipeline_mode<synchronous>, transform_indices = @transform_5, window_bounds = array<i64: 32, 1>}, {transform_indices = @transform_6, window_bounds = array<i64: 1, 1>}, {transform_indices = @transform_7, window_bounds = array<i64: 8, 1>}]} {
    %c0 = arith.constant 0 : index
    %c0_0 = arith.constant 0 : index
    %0 = vector.load %arg1[%c0, %c0_0] : memref<8x32xf32, #tpu.memory_space<vmem>>, vector<8x32xf32>
    %1 = arith.truncf %0 : vector<8x32xf32> to vector<8x32xbf16>
    %c0_1 = arith.constant 0 : index
    %c0_2 = arith.constant 0 : index
    %2 = vector.load %arg2[%c0_1, %c0_2] : memref<32x64xbf16, #tpu.memory_space<vmem>>, vector<32x64xbf16>
    %cst = arith.constant dense<0.000000e+00> : vector<8x64xf32>
    %3 = tpu.matmul %1, %2, %cst {dimension_numbers = #tpu.dot_dimension_numbers<[1], [0], [0], [1], [0, 0, 1, 1], [], []>} : vector<8x32xbf16>, vector<32x64xbf16>, vector<8x64xf32> -> vector<8x64xf32>
    %c0_3 = arith.constant 0 : index
    %c0_4 = arith.constant 0 : index
    %4 = vector.load %arg3[%c0_3, %c0_4] : memref<1x64xf32, #tpu.memory_space<vmem>>, vector<1x64xf32>
    %5 = vector.broadcast %4 : vector<1x64xf32> to vector<8x64xf32>
    %6 = arith.addf %3, %5 : vector<8x64xf32>
    %cst_5 = arith.constant 0.000000e+00 : f32
    %7 = vector.broadcast %cst_5 : f32 to vector<8x64xf32>
    %8 = arith.maximumf %6, %7 : vector<8x64xf32>
    %9 = arith.truncf %8 : vector<8x64xf32> to vector<8x64xbf16>
    %c0_6 = arith.constant 0 : index
    %c0_7 = arith.constant 0 : index
    %10 = vector.load %arg4[%c0_6, %c0_7] : memref<64x32xbf16, #tpu.memory_space<vmem>>, vector<64x32xbf16>
    %cst_8 = arith.constant dense<0.000000e+00> : vector<8x32xf32>
    %11 = tpu.matmul %9, %10, %cst_8 {dimension_numbers = #tpu.dot_dimension_numbers<[1], [0], [0], [1], [0, 0, 1, 1], [], []>} : vector<8x64xbf16>, vector<64x32xbf16>, vector<8x32xf32> -> vector<8x32xf32>
    %c0_9 = arith.constant 0 : index
    %c0_10 = arith.constant 0 : index
    %12 = vector.load %arg5[%c0_9, %c0_10] : memref<1x32xf32, #tpu.memory_space<vmem>>, vector<1x32xf32>
    %13 = vector.broadcast %12 : vector<1x32xf32> to vector<8x32xf32>
    %14 = arith.addf %11, %13 : vector<8x32xf32>
    %cst_11 = arith.constant 0.000000e+00 : f32
    %15 = vector.broadcast %cst_11 : f32 to vector<8x32xf32>
    %16 = arith.maximumf %14, %15 : vector<8x32xf32>
    %17 = arith.truncf %16 : vector<8x32xf32> to vector<8x32xbf16>
    %c0_12 = arith.constant 0 : index
    %c0_13 = arith.constant 0 : index
    %18 = vector.load %arg6[%c0_12, %c0_13] : memref<32x1xbf16, #tpu.memory_space<vmem>>, vector<32x1xbf16>
    %cst_14 = arith.constant dense<0.000000e+00> : vector<8x1xf32>
    %19 = tpu.matmul %17, %18, %cst_14 {dimension_numbers = #tpu.dot_dimension_numbers<[1], [0], [0], [1], [0, 0, 1, 1], [], []>} : vector<8x32xbf16>, vector<32x1xbf16>, vector<8x1xf32> -> vector<8x1xf32>
    %c0_15 = arith.constant 0 : index
    %c0_16 = arith.constant 0 : index
    %20 = memref.load %arg7[%c0_15, %c0_16] : memref<1x1xf32, #tpu.memory_space<smem>>
    %21 = vector.broadcast %20 : f32 to vector<8x1xf32>
    %22 = arith.addf %19, %21 : vector<8x1xf32>
    %23 = arith.negf %22 : vector<8x1xf32>
    %24 = math.exp %23 : vector<8x1xf32>
    %cst_17 = arith.constant 1.000000e+00 : f32
    %25 = vector.broadcast %cst_17 : f32 to vector<8x1xf32>
    %26 = arith.addf %25, %24 : vector<8x1xf32>
    %27 = arith.divf %25, %26 : vector<8x1xf32>
    %c0_18 = arith.constant 0 : index
    %c0_19 = arith.constant 0 : index
    %28 = vector.load %arg8[%c0_18, %c0_19] : memref<8x1xf32, #tpu.memory_space<vmem>>, vector<8x1xf32>
    tpu.vector_store %arg8[%c0_18, %c0_19], %27 {strides = array<i32>} : memref<8x1xf32, #tpu.memory_space<vmem>>, vector<8x1xf32>,
    return
  }
  func.func @transform_0(%arg0: i32) -> (i32, i32) {
    %c0_i32 = arith.constant 0 : i32
    %c0_i32_0 = arith.constant 0 : i32
    return %arg0, %c0_i32 : i32, i32
  }
  func.func @transform_1(%arg0: i32) -> (i32, i32) {
    %c0_i32 = arith.constant 0 : i32
    %c0_i32_0 = arith.constant 0 : i32
    %c0_i32_1 = arith.constant 0 : i32
    return %c0_i32, %c0_i32_0 : i32, i32
  }
  func.func @transform_2(%arg0: i32) -> (i32, i32) {
    %c0_i32 = arith.constant 0 : i32
    %c0_i32_0 = arith.constant 0 : i32
    %c0_i32_1 = arith.constant 0 : i32
    return %c0_i32, %c0_i32_0 : i32, i32
  }
  func.func @transform_3(%arg0: i32) -> (i32, i32) {
    %c0_i32 = arith.constant 0 : i32
    %c0_i32_0 = arith.constant 0 : i32
    %c0_i32_1 = arith.constant 0 : i32
    return %c0_i32, %c0_i32_0 : i32, i32
  }
  func.func @transform_4(%arg0: i32) -> (i32, i32) {
    %c0_i32 = arith.constant 0 : i32
    %c0_i32_0 = arith.constant 0 : i32
    %c0_i32_1 = arith.constant 0 : i32
    return %c0_i32, %c0_i32_0 : i32, i32
  }
  func.func @transform_5(%arg0: i32) -> (i32, i32) {
    %c0_i32 = arith.constant 0 : i32
    %c0_i32_0 = arith.constant 0 : i32
    %c0_i32_1 = arith.constant 0 : i32
    return %c0_i32, %c0_i32_0 : i32, i32
  }
  func.func @transform_6(%arg0: i32) -> (i32, i32) {
    %c0_i32 = arith.constant 0 : i32
    %c0_i32_0 = arith.constant 0 : i32
    %c0_i32_1 = arith.constant 0 : i32
    return %c0_i32, %c0_i32_0 : i32, i32
  }
  func.func @transform_7(%arg0: i32) -> (i32, i32) {
    %c0_i32 = arith.constant 0 : i32
    %c0_i32_0 = arith.constant 0 : i32
    return %arg0, %c0_i32 : i32, i32
  }
}

</mosaic_0001>

<bundles_post_ra>
// kernel: tpu_custom_call.1
= control target key start
LH: loop header
LB: loop body
LE: loop exit
PB: predicated region body
PF: predicated region fallthrough
CT: control target
= control target key end

     0   :  { %vm50_vm0 = vcmask 261120   ;;  %vm105_vm1 = vcmask 523264   ;;  %vm177_vm5 = vcmask 7168   ;;  %s314_s1 = inlined_call_operand.vmem [shape: bf16[32,64], index: 1, kind: input, shape index: {}]   ;;  %s315_s0 = inlined_call_operand.vmem [shape: f32[8,32], index: 0, kind: input, shape index: {}]   ;;  %s316_s3 = inlined_call_operand.vmem [shape: bf16[64,32], index: 3, kind: input, shape index: {}]   ;;  %s317_s2 = inlined_call_operand.vmem [shape: f32[1,64], index: 2, kind: input, shape index: {}]   ;;  %s318_s4 = inlined_call_operand.vmem [shape: f32[1,32], index: 4, kind: input, shape index: {}]   ;;  %s319_s5 = inlined_call_operand.vmem [shape: bf16[32,1], index: 5, kind: input, shape index: {}]   ;;  %s320_s6 = inlined_call_operand.<no memory space> [shape: f32[1,1], index: 6, kind: input, shape index: {}]   ;;  %s321_s7 = inlined_call_operand.vmem [shape: f32[8,1], index: 7, kind: output, shape index: {}]  }
   0x1   :  { %v220_v0 = vld [vmem:[%s314_s1 + $0x8] sm:$0xff]  ;;  %v224_v1 = vld [vmem:[%s316_s3 + $0x18] sm:$0xff]  ;;  %v219_v2 = vld [vmem:[%s314_s1] sm:$0xff]  ;;  %v129_v22 = vstv %s320_s6 }
   0x2   :  { %60 = vmatpush.bf16.msra.mxu0 %v220_v0  ;;  %v28_v3 = vld [vmem:[%s315_s0] sm:$0xff]  ;;  %113 = vmatpush.bf16.msra.mxu1 %v224_v1  ;;  %v223_v4 = vld [vmem:[%s316_s3 + $0x10] sm:$0xff]  ;;  %v222_v6 = vld [vmem:[%s316_s3 + $0x8] sm:$0xff] }
   0x3   :  { %v29_v5 = vpack.c.bf16 %v28_v3, %v28_v3  ;;  %v221_v7 = vld [vmem:[%s316_s3] sm:$0xff]  ;;  %v226_v14 = vld [vmem:[%s319_s5 + $0x8] sm:$0xff] }
   0x4   :  { %v227_v8 = vld [vmem:[%s317_s2] ss:$0 sm:$0xff]  ;;  %151 = vmatpush.bf16.msra.mxu2 %v226_v14 }
   0x5   :  { %v225_v15 = vld [vmem:[%s319_s5] sm:$0xff] }
   0x6   :  { %61 = vmatpush.bf16.msra.mxu0 %v219_v2  ;;  %114 = vmatpush.bf16.msra.mxu1 %v223_v4  ;;  %v228_v16 = vld [vmem:[%s318_s4] ss:$0 sm:$0xff] }
   0x8   :  { %152 = vmatpush.bf16.msra.mxu2 %v225_v15 }
   0x9   :  { %191 = vmatmul.msk.bf16.vlgmr.msra.gmra.mxu0 %vm50_vm0, %v29_v5 }
   0xa   :  { %115 = vmatpush.bf16.msra.mxu1 %v222_v6 }
   0xe   :  { %116 = vmatpush.bf16.msra.mxu1 %v221_v7 }
  0x86   :  { %v63_v9 = vpop.f32.mrf.mxu0 }
  0x87   :  { %v64_v10 = vadd.f32 %v227_v8, %v63_v9 }
  0x89   :  { %v67_v11 = vmax.f32 %v64_v10, 0.0 }
  0x8b   :  { %v68_v12 = vpack.c.bf16 %v67_v11, %v67_v11 }
  0x8d   :  { %208 = vmatmul.msk.bf16.vlgmr.msra.gmra.mxu1 %vm105_vm1, %v68_v12 }
  0x8e   :  { %v65_v13 = vpop.f32.mrf.mxu0 }
 0x10a   :  { %v118_v17 = vpop.f32.mrf.mxu1 }
 0x10b   :  { %v119_v18 = vadd.f32 %v228_v16, %v118_v17 }
 0x10d   :  { %v122_v19 = vmax.f32 %v119_v18, 0.0 }
 0x10f   :  { %v123_v20 = vpack.c.bf16 %v122_v19, %v122_v19 }
 0x111   :  { %217 = vmatmul.msk.bf16.vlgmr.msra.gmra.mxu2 %vm50_vm0, %v123_v20 }
 0x112   :  { %v120_v21 = vpop.f32.mrf.mxu1 }
 0x194   :  { %v154_v23 = vpop.f32.mrf.mxu2 }
 0x195   :  { %v155_v24 = vadd.f32 %v154_v23, %v129_v22 }
 0x197   :  { %v218_v25 = vmul.f32 -1.442695, %v155_v24 }
 0x199   :  { %229 = vpow2.f32 %v218_v25 }
 0x19c   :  { %v156_v26 = vpop.f32.mrf.mxu2 }
 0x19f   :  { %v230_v27 = vpop.eup %229 }
 0x1a0   :  { %v161_v28 = vadd.f32 1.0, %v230_v27 }
 0x1a2   :  { %231 = vrcp.f32 %v161_v28  ;;  %v173_v32 = vand.u32 2147483648, %v161_v28  ;;  %v171_v34 = vand.u32 2147483647, %v161_v28  ;;  %vm167_vm3 = vweird.f32 %v161_v28 }
 0x1a4   :  { %v174_v36 = vor.u32 1.1754944e-38, %v173_v32  ;;  %vm172_vm6 = vcmp.eq.f32.partialorder %v171_v34, 8.507059e+37 }
 0x1a8   :  { %v232_v29 = vpop.eup %231 }
 0x1a9   :  { %v163_v30 = vmul.f32 %v232_v29, %v161_v28  ;;  %vm168_vm2 = vweird.f32 %v232_v29 }
 0x1aa   :  { %vm169_vm4 = vmor %vm167_vm3, %vm168_vm2 }
 0x1ab   :  { %v164_v31 = vsub.f32 1.0, %v163_v30 }
 0x1ad   :  { %v165_v33 = vmul.f32 %v232_v29, %v164_v31 }
 0x1af   :  { %v166_v35 = vadd.f32 %v232_v29, %v165_v33 }
 0x1b1   :  { %v170_v37 = vsel %vm169_vm4, %v232_v29, %v166_v35 }
 0x1b2   :  { %v175_v38 = vsel %vm172_vm6, %v174_v36, %v170_v37 }
 0x1b3   :  { %178 = vst.msk [vmem:[%s321_s7] sm:$0xff] %vm177_vm5, %v175_v38 }

</bundles_post_ra>
